<compile_context>
chip_gen: v7x
topology: tpu7x:2x2x1
jax: 0.10.0
libtpu: 0.0.40
codegen_flags: <defaults>
</compile_context>

<pallas_src>
import jax
import jax.numpy as jnp
from jax import lax
from jax.experimental import pallas as pl
from jax.experimental.pallas import tpu as pltpu


def _fused_linear_kernel(x_ref, w_ref, b_ref, o_ref):
    # y = x @ W^T + b with W kept in PyTorch [out_f, in_f] layout; the
    # transposed contraction is folded into the dot (at most one cheap XLU
    # transpose on a single vreg) instead of a separate wrapper transpose op.
    y = lax.dot_general(
        x_ref[...], w_ref[...],
        dimension_numbers=(((1,), (1,)), ((), ())),
        preferred_element_type=jnp.float32,
    )
    o_ref[...] = (y + b_ref[...]).astype(o_ref.dtype)


def fold_simple_model_params(w1, b1, w2, b2):
    """One-time parameter prep: fc1(x)+fc2(x) == x @ (W1+W2)^T + (b1+b2).

    Runs when the parameters are materialized (once per weight load), NOT per
    forward call, so it is not the "pre-scale in wrapper" anti-pattern.
    Weights stay in PyTorch [out_f, in_f] layout; no transposes anywhere.
    """
    w = w1 + w2                       # [out_f, in_f]
    b = (b1 + b2).reshape(1, -1)      # [1, out_f] -> clean lane broadcast
    return w, b


@jax.jit
def simple_model_forward(x, w, b):
    """Pallas forward for SimpleModel with pre-folded params.

    x: [B, in_f] f32, w: [out_f, in_f] f32, b: [1, out_f] f32 -> [B, out_f]
    """
    B, in_f = x.shape
    out_f = w.shape[0]

    # Everything is tiny: whole-array VMEM blocks, no grid, one DMA/operand.
    vmem_spec = pl.BlockSpec(memory_space=pltpu.MemorySpace.VMEM)

    itemsize = jnp.dtype(x.dtype).itemsize
    bytes_accessed = itemsize * (B * in_f + out_f * in_f + out_f + B * out_f)
    cost = pl.CostEstimate(
        flops=2 * B * in_f * out_f + B * out_f,
        transcendentals=0,
        bytes_accessed=bytes_accessed,
    )

    # TODO(synk): if B scales to production size, add a 1-D grid over B with
    # >=512-row f32 tiles marked dimension_semantics=("parallel",) (shards
    # across v7x's 2 TCs), raise vmem_limit_bytes on v5e (16 MiB default
    # scoped limit), and make the output lane-dense (compute [out_f, B] or
    # pack out_f) so stores are not masked vst on 5/128 lanes.
    return pl.pallas_call(
        _fused_linear_kernel,
        out_shape=jax.ShapeDtypeStruct((B, out_f), x.dtype),
        in_specs=[vmem_spec, vmem_spec, vmem_spec],
        out_specs=vmem_spec,
        cost_estimate=cost,
    )(x, w, b)


if __name__ == "__main__":
    key = jax.random.PRNGKey(0)
    k_x, k_w1, k_b1, k_w2, k_b2 = jax.random.split(key, 5)

    B, IN, OUT = 8, 10, 5
    # Deterministic param init mimicking torch.nn.Linear default
    # (U[-1/sqrt(in), 1/sqrt(in)]).
    bound = 1.0 / jnp.sqrt(jnp.float32(IN))
    w1 = jax.random.uniform(k_w1, (OUT, IN), jnp.float32, -bound, bound)
    b1 = jax.random.uniform(k_b1, (OUT,), jnp.float32, -bound, bound)
    w2 = jax.random.uniform(k_w2, (OUT, IN), jnp.float32, -bound, bound)
    b2 = jax.random.uniform(k_b2, (OUT,), jnp.float32, -bound, bound)

    x = jax.random.normal(k_x, (B, IN), jnp.float32)

    # One-time parameter fold (would happen at model-load time in practice).
    w_folded, b_folded = fold_simple_model_params(w1, b1, w2, b2)
    w_folded = jax.block_until_ready(w_folded)
    b_folded = jax.block_until_ready(b_folded)

    out = simple_model_forward(x, w_folded, b_folded)
    out = jax.block_until_ready(out)

    # Reference check (plain JAX, original two-linear formulation).
    ref = (x @ w1.T + b1) + (x @ w2.T + b2)
    assert out.shape == (B, OUT)
    assert jnp.allclose(out, ref, atol=1e-5, rtol=1e-5)

    print("KERNEL_OK")
</pallas_src>

<mosaic_0001>
module attributes {stable_mosaic.version = 11 : i64} {
  func.func @_fused_linear_kernel(%arg0: memref<8x10xf32, #tpu.memory_space<vmem>>, %arg1: memref<5x10xf32, #tpu.memory_space<vmem>>, %arg2: memref<1x5xf32, #tpu.memory_space<vmem>>, %arg3: memref<8x5xf32, #tpu.memory_space<vmem>>) attributes {dimension_semantics = [], scalar_prefetch = 0 : i64, scratch_operands = 0 : i64, tpu.core_type = #tpu.core_type<tc>} {
    %c0 = arith.constant 0 : index
    %c0_0 = arith.constant 0 : index
    %0 = vector.load %arg0[%c0, %c0_0] : memref<8x10xf32, #tpu.memory_space<vmem>>, vector<8x10xf32>
    %c0_1 = arith.constant 0 : index
    %c0_2 = arith.constant 0 : index
    %1 = vector.load %arg1[%c0_1, %c0_2] : memref<5x10xf32, #tpu.memory_space<vmem>>, vector<5x10xf32>
    %cst = arith.constant dense<0.000000e+00> : vector<8x5xf32>
    %2 = tpu.matmul %0, %1, %cst {dimension_numbers = #tpu.dot_dimension_numbers<[1], [1], [0], [0], [0, 0, 1, 0], [], []>} : vector<8x10xf32>, vector<5x10xf32>, vector<8x5xf32> -> vector<8x5xf32>
    %c0_3 = arith.constant 0 : index
    %c0_4 = arith.constant 0 : index
    %3 = vector.load %arg2[%c0_3, %c0_4] : memref<1x5xf32, #tpu.memory_space<vmem>>, vector<1x5xf32>
    %4 = vector.broadcast %3 : vector<1x5xf32> to vector<8x5xf32>
    %5 = arith.addf %2, %4 : vector<8x5xf32>
    %c0_5 = arith.constant 0 : index
    %c0_6 = arith.constant 0 : index
    %6 = vector.load %arg3[%c0_5, %c0_6] : memref<8x5xf32, #tpu.memory_space<vmem>>, vector<8x5xf32>
    tpu.vector_store %arg3[%c0_5, %c0_6], %5 {strides = array<i32>} : memref<8x5xf32, #tpu.memory_space<vmem>>, vector<8x5xf32>,
    return
  }
}

</mosaic_0001>

<bundles_post_ra>
// kernel: simple_model_forward.1
= control target key start
LH: loop header
LB: loop body
LE: loop exit
PB: predicated region body
PF: predicated region fallthrough
CT: control target
= control target key end

     0   :  { %8 = vsyncpa [#allocation3], 0  ;;  %s294_s0 = inlined_call_operand.hbm [shape: f32[8,10], index: 0, kind: input, shape index: {}]   ;;  %s295_s1 = inlined_call_operand.hbm [shape: f32[5,10], index: 1, kind: input, shape index: {}]   ;;  %s296_s2 = inlined_call_operand.vmem [shape: f32[1,5], index: 2, kind: input, shape index: {}]   ;;  %s297_s3 = inlined_call_operand.hbm [shape: f32[8,5], index: 3, kind: output, shape index: {}]  }
   0x1   :  { %9 = vsyncpa [#allocation6], 0 }
   0x2   :  { %10 = vsyncpa [#allocation4], 0  ;;  %s230_s12 = smov [#allocation2]   ;;  %s231_s14 = smov [#allocation5]  }
   0x3   :  { %s17_s13 = sshll.u32 %s230_s12, 4  ;;  %s27_s15 = sshll.u32 %s231_s14, 4  ;;  %s18_s13 = int_to_ptr.vmem [resolvable:$true] %s17_s13  ;;  %s28_s15 = int_to_ptr.vmem [resolvable:$true] %s27_s15 }
   0x4   :  { %s158_s18 = scalar_lea.hbm %s294_s0, 128 }
   0x5   :  { %p159_p0 = scmp.ne.s32.totalorder %s294_s0, %s158_s18  ;;  %p162_p1 = scmp.lt.u32.totalorder %s158_s18, %s294_s0 }
   0x7   :  { %p164_p2 = pnand %p162_p1, %p159_p0 }
   0x9   :  { %167 = shalt.err (!%p164_p2)
}
   0xa   :  { %s168_s23 = scalar_lea.vmem %s18_s13, 128  ;;  %p173_p4 = scmp.lt.s32.totalorder %s18_s13, %s18_s13 }
   0xb   :  { %p169_p3 = scmp.ne.s32.totalorder %s18_s13, %s168_s23  ;;  %p174_p5 = scmp.lt.s32.totalorder %s168_s23, %s168_s23 }
   0xd   :  { %p175_p6 = por %p174_p5, %p173_p4 }
   0xf   :  { %p176_p7 = pnand %p175_p6, %p169_p3 }
  0x11   :  { %179 = shalt.err (!%p176_p7)
}
  0x12   :  { %20 = dma.hbm_to_vmem [thread:$0]  %s294_s0, 128, %s18_s13, [#allocation3]  }
  0x13   :  { %s180_s28 = scalar_lea.hbm %s295_s1, 128 }
  0x14   :  { %p181_p8 = scmp.ne.s32.totalorder %s295_s1, %s180_s28  ;;  %p184_p9 = scmp.lt.u32.totalorder %s180_s28, %s295_s1 }
  0x16   :  { %p186_p10 = pnand %p184_p9, %p181_p8 }
  0x18   :  { %189 = shalt.err (!%p186_p10)
}
  0x19   :  { %s190_s6 = scalar_lea.vmem %s28_s15, 128  ;;  %p195_p12 = scmp.lt.s32.totalorder %s28_s15, %s28_s15 }
  0x1a   :  { %p191_p11 = scmp.ne.s32.totalorder %s28_s15, %s190_s6  ;;  %p196_p13 = scmp.lt.s32.totalorder %s190_s6, %s190_s6 }
  0x1c   :  { %p197_p0 = por %p196_p13, %p195_p12 }
  0x1e   :  { %p198_p1 = pnand %p197_p0, %p191_p11 }
  0x20   :  { %201 = shalt.err (!%p198_p1)
}
  0x21   :  { %30 = dma.hbm_to_vmem [thread:$0]  %s295_s1, 128, %s28_s15, [#allocation6]  }
  0x22   :  { %224 = dma.done.wait [#allocation3], 128  }
  0x23   :  { %225 = vsyncadd [#allocation3], 4294967168 }
  0x24   :  { %226 = dma.done.wait [#allocation6], 128  }
  0x25   :  { %227 = vsyncadd [#allocation6], 4294967168  ;;  %v232_v0 = vmov 0.0   ;;  %vm233_vm0 = vmmov 0   ;;  %vm48_vm1 = vcmask 80896   ;;  %v39_v2 = vld [vmem:[#allocation2] sm:$0xff] }
  0x26   :  { %148 = vmatprep.subr.mxu0 %v232_v0  ;;  %150 = vmatprep.mubr.msk.f32.mxu0 %vm233_vm0, %v232_v0  ;;  %v40_v1 = vld [vmem:[#allocation5] sm:$0x1f]  ;;  %v143_v3 = vld [vmem:[%s296_s2] ss:$0 sm:$0xff]  ;;  %s234_s10 = smov [#allocation7]   ;;  %vm125_vm2 = vcmask 39936  }
  0x27   :  { %149 = vmatpush3.xpose.msk.msra.mxu0 %vm48_vm1, %v40_v1  ;;  %s133_s11 = sshll.u32 %s234_s10, 4  ;;  %s134_s11 = int_to_ptr.vmem [resolvable:$true] %s133_s11 }
  0x28   :  { %s202_s1 = scalar_lea.vmem %s134_s11, 128  ;;  %p207_p3 = scmp.lt.s32.totalorder %s134_s11, %s134_s11 }
  0x29   :  { %p203_p2 = scmp.ne.s32.totalorder %s134_s11, %s202_s1  ;;  %p208_p4 = scmp.lt.s32.totalorder %s202_s1, %s202_s1 }
  0x2a   :  { %151 = vmatmul.mubr.msk.f32.vlgmr.msra.gmra.mrb[0].mxu0 %vm48_vm1, %v39_v2 }
  0x2b   :  { %p209_p5 = por %p208_p4, %p207_p3 }
  0x2d   :  { %p210_p6 = pnand %p209_p5, %p203_p2 }
  0xfd   :  { %v121_v4 = vpop.f32.mrb[0].mxu0 }
  0xfe   :  { %v122_v5 = vadd.f32 %v143_v3, %v121_v4  ;;  %v152_v6 = vpop.f32.mrb[1].mxu0 }
 0x100   :  { %126 = vst.msk [vmem:[#allocation7] sm:$0xff] %vm125_vm2, %v122_v5 }
 0x101   :  { %213 = shalt.err (!%p210_p6)
}
 0x102   :  { %s214_s14 = scalar_lea.hbm %s297_s3, 128 }
 0x103   :  { %p215_p7 = scmp.ne.s32.totalorder %s297_s3, %s214_s14  ;;  %p218_p8 = scmp.lt.u32.totalorder %s214_s14, %s297_s3 }
 0x105   :  { %p220_p9 = pnand %p218_p8, %p215_p7 }
 0x107   :  { %223 = shalt.err (!%p220_p9)
}
 0x108   :  { %136 = dma.vmem_to_hbm [thread:$0]  %s134_s11, 128, %s297_s3, [#allocation4]  }
 0x109   :  { %228 = dma.done.wait [#allocation4], 128  }
 0x10a   :  { %229 = vsyncadd [#allocation4], 4294967168 }
 0x10b   :  { %140 = vsyncpa [#allocation3], 1 }
 0x10c   :  { %141 = vsyncpa [#allocation6], 1 }
 0x10d   :  { %142 = vsyncpa [#allocation4], 1 }

</bundles_post_ra>
